<compile_context>
chip_gen: v7x
topology: tpu7x:2x2x1
jax: 0.10.0
libtpu: 0.0.40
codegen_flags: <defaults>
</compile_context>

<pallas_src>
import functools

import jax
import jax.numpy as jnp
from jax import lax
from jax.experimental import pallas as pl
from jax.experimental.pallas import tpu as pltpu


def _round_up(x, m):
    return ((x + m - 1) // m) * m


# ---------------------------------------------------------------------------
# Kernel 1: STFT via one fused real-DFT matmul (MXU) + power compression.
# Grid = (batch, frame-tiles). Rows (sublanes) = frames, lanes = one-sided
# frequency bins padded to a multiple of 128 (lane-dense outputs).
# ---------------------------------------------------------------------------
def _stft_compress_kernel(frames_ref, dft_ref, re_ref, im_ref, *, f_pad):
    fr = frames_ref[0, :, :]                               # [tile_t, n_fft] bf16
    # single fused matmul: DFT columns [0:f_pad) = cos, [f_pad:2*f_pad) = -sin
    spec = jnp.dot(fr, dft_ref[...], preferred_element_type=jnp.float32)
    re = spec[:, :f_pad]                                   # lane-aligned slices
    im = spec[:, f_pad:]
    # power compression: (re, im) * (re^2 + im^2)**-0.25, and 0 at mag == 0
    mag2 = re * re + im * im
    safe = jnp.where(mag2 > 0.0, mag2, 1.0)
    scale = lax.rsqrt(jnp.sqrt(safe))                      # mag2 ** -0.25
    scale = jnp.where(mag2 > 0.0, scale, 0.0)
    re_ref[0, :, :] = re * scale
    im_ref[0, :, :] = im * scale


# ---------------------------------------------------------------------------
# Kernel 2: ComMagEuclideanLoss reductions. Grid = (batch,).
# Each stage estimate is streamed as its own input (native dtype, upcast in
# kernel). Stage losses are accumulated elementwise; one reduction per output.
# ---------------------------------------------------------------------------
def _loss_kernel(*refs, num_stages, alphas):
    lab_ref = refs[0]
    est_refs = refs[1:1 + num_stages]
    out1_ref = refs[1 + num_stages]
    out2_ref = refs[2 + num_stages]

    lre = lab_ref[0, 0, :, :]                              # [F, T] f32
    lim = lab_ref[0, 1, :, :]
    mag_lab = jnp.sqrt(lre * lre + lim * lim)

    acc1 = jnp.zeros_like(lre)
    acc2 = jnp.zeros_like(lre)
    for s in range(num_stages):                            # static unroll
        a = alphas[s]
        ere = est_refs[s][0, 0, :, :].astype(jnp.float32)
        eim = est_refs[s][0, 1, :, :].astype(jnp.float32)
        dre = ere - lre
        dim = eim - lim
        acc1 = acc1 + a * (dre * dre + dim * dim)          # both RI channels
        mag_est = jnp.sqrt(ere * ere + eim * eim)
        dmag = mag_est - mag_lab
        acc2 = acc2 + a * (dmag * dmag)

    # One reduction each; broadcast the scalar over a native (8,128) tile so
    # the store is a plain unmasked lane-dense store.
    out1_ref[...] = jnp.broadcast_to(jnp.sum(acc1), (1, 8, 128))
    out2_ref[...] = jnp.broadcast_to(jnp.sum(acc2), (1, 8, 128))


def gagnet_loss(ests, refs, *, n_fft, hop_length, win_length):
    """ests: sequence of [B, 2, F, T] stage estimates;  refs: [B, L] waveform."""
    refs = refs.astype(jnp.float32)
    B, L = refs.shape
    F = n_fft // 2 + 1
    T = L // hop_length + 1                 # torch.stft frames (center=True)

    # --- per-utterance RMS normalization (glue) ---
    c = jnp.sqrt(L / jnp.sum(refs * refs, axis=-1))
    refs = refs * c[:, None]

    # --- torch.stft framing: center=True -> reflect pad by n_fft//2 (glue) ---
    pad = n_fft // 2
    padded = jnp.pad(refs, ((0, 0), (pad, pad)), mode="reflect")
    lp = padded.shape[-1]

    # frame-row tiling; pad frame count so the row grid divides evenly
    # (the extra clamped frames are dropped before the loss).
    if T <= 512:
        tile_t = _round_up(T, 16)
    else:
        tile_t = 256
    t_pad = _round_up(T, tile_t)

    starts = hop_length * jnp.arange(t_pad, dtype=jnp.int32)
    idx = starts[:, None] + jnp.arange(n_fft, dtype=jnp.int32)[None, :]
    idx = jnp.minimum(idx, lp - 1)
    frames = padded[:, idx]                                # [B, t_pad, n_fft]
    # TODO(synk): fuse framing+window into kernel 1 via manual DMA
    # (memory_space=pl.ANY) to avoid materializing the overlapped frames.

    n = jnp.arange(win_length, dtype=jnp.float32)
    window = 0.5 - 0.5 * jnp.cos(2.0 * jnp.pi * n / win_length)  # periodic Hann
    if win_length < n_fft:                  # torch zero-pads the window centered
        left = (n_fft - win_length) // 2
        window = jnp.pad(window, (left, n_fft - win_length - left))
    frames = (frames * window[None, None, :]).astype(jnp.bfloat16)

    # fused real-DFT matrix [n_fft, 2*f_pad]: [cos | -sin], zero-padded lanes
    f_pad = _round_up(F, 128)
    k = jnp.arange(n_fft, dtype=jnp.float32)[:, None]
    f = jnp.arange(F, dtype=jnp.float32)[None, :]
    ang = 2.0 * jnp.pi * k * f / n_fft
    dft = jnp.zeros((n_fft, 2 * f_pad), jnp.float32)
    dft = dft.at[:, :F].set(jnp.cos(ang))
    dft = dft.at[:, f_pad:f_pad + F].set(-jnp.sin(ang))
    dft = dft.astype(jnp.bfloat16)

    comp_re, comp_im = pl.pallas_call(
        functools.partial(_stft_compress_kernel, f_pad=f_pad),
        grid=(B, t_pad // tile_t),
        out_shape=(jax.ShapeDtypeStruct((B, t_pad, f_pad), jnp.float32),
                   jax.ShapeDtypeStruct((B, t_pad, f_pad), jnp.float32)),
        in_specs=[
            pl.BlockSpec((1, tile_t, n_fft), lambda b, t: (b, t, 0)),
            pl.BlockSpec((n_fft, 2 * f_pad), lambda b, t: (0, 0)),
        ],
        out_specs=(
            pl.BlockSpec((1, tile_t, f_pad), lambda b, t: (b, t, 0)),
            pl.BlockSpec((1, tile_t, f_pad), lambda b, t: (b, t, 0)),
        ),
        compiler_params=pltpu.CompilerParams(
            dimension_semantics=("parallel", "parallel")),
    )(frames, dft)

    # compressed target spectrum in the estimates' [B, 2, F, T] layout
    # (single fused XLA slice + transpose of the small label arrays)
    lab = jnp.stack([comp_re[:, :T, :F], comp_im[:, :T, :F]], axis=1)
    lab = lab.transpose(0, 1, 3, 2)                        # [B, 2, F, T]

    S = len(ests)
    alphas = [0.1] * S
    alphas[-1] = 1.0

    # All utterances share refs.shape[-1] -> frame-validity mask is all ones,
    # so mask.sum() is a compile-time constant (com_mask.sum() is 2x that).
    # TODO(synk): per-utterance lengths would need a real frame-validity mask.
    msum = float(B * F * T)

    part1, part2 = pl.pallas_call(
        functools.partial(_loss_kernel, num_stages=S, alphas=tuple(alphas)),
        grid=(B,),
        out_shape=(jax.ShapeDtypeStruct((B, 8, 128), jnp.float32),
                   jax.ShapeDtypeStruct((B, 8, 128), jnp.float32)),
        in_specs=[pl.BlockSpec((1, 2, F, T), lambda b: (b, 0, 0, 0))] * (S + 1),
        out_specs=(pl.BlockSpec((1, 8, 128), lambda b: (b, 0, 0)),
                   pl.BlockSpec((1, 8, 128), lambda b: (b, 0, 0))),
        compiler_params=pltpu.CompilerParams(
            dimension_semantics=("parallel",)),
    )(lab, *ests)

    loss1 = jnp.sum(part1[:, 0, 0]) / (2.0 * msum)   # com_mask.sum() == 2*msum
    loss2 = jnp.sum(part2[:, 0, 0]) / msum
    return 0.5 * (loss1 + loss2)


if __name__ == "__main__":
    key = jax.random.PRNGKey(0)
    n_fft, hop, win = 32, 16, 32
    B, L = 2, 256
    F = n_fft // 2 + 1          # 17
    T = L // hop + 1            # 17

    k_ref, k_e1, k_e2 = jax.random.split(key, 3)
    refs = jax.random.normal(k_ref, (B, L), dtype=jnp.float32)
    ests = [                    # two GaGNet stages, each [B, 2, F, T]
        0.1 * jax.random.normal(k_e1, (B, 2, F, T), dtype=jnp.float32),
        0.1 * jax.random.normal(k_e2, (B, 2, F, T), dtype=jnp.float32),
    ]

    loss_fn = jax.jit(functools.partial(
        gagnet_loss, n_fft=n_fft, hop_length=hop, win_length=win))
    loss = loss_fn(ests, refs)
    jax.block_until_ready(loss)
    print("KERNEL_OK")
</pallas_src>

<mosaic_0001>
module attributes {stable_mosaic.version = 11 : i64} {
  func.func @_stft_compress_kernel(%arg0: i32, %arg1: i32, %arg2: memref<1x32x32xbf16, #tpu.memory_space<vmem>>, %arg3: memref<32x256xbf16, #tpu.memory_space<vmem>>, %arg4: memref<1x32x128xf32, #tpu.memory_space<vmem>>, %arg5: memref<1x32x128xf32, #tpu.memory_space<vmem>>) attributes {dimension_semantics = [#tpu.dimension_semantics<parallel>, #tpu.dimension_semantics<parallel>], iteration_bounds = array<i64: 2, 1>, scalar_prefetch = 0 : i64, scratch_operands = 0 : i64, tpu.core_type = #tpu.core_type<tc>, window_params = [{transform_indices = @transform_0, window_bounds = array<i64: 1, 32, 32>}, {pipeline_mode = #tpu.pipeline_mode<synchronous>, transform_indices = @transform_1, window_bounds = array<i64: 32, 256>}, {transform_indices = @transform_2, window_bounds = array<i64: 1, 32, 128>}, {transform_indices = @transform_3, window_bounds = array<i64: 1, 32, 128>}]} {
    %c0 = arith.constant 0 : index
    %c0_0 = arith.constant 0 : index
    %c0_1 = arith.constant 0 : index
    %0 = vector.load %arg2[%c0, %c0_0, %c0_1] : memref<1x32x32xbf16, #tpu.memory_space<vmem>>, vector<1x32x32xbf16>
    %1 = vector.shape_cast %0 : vector<1x32x32xbf16> to vector<32x32xbf16>
    %c0_2 = arith.constant 0 : index
    %c0_3 = arith.constant 0 : index
    %2 = vector.load %arg3[%c0_2, %c0_3] : memref<32x256xbf16, #tpu.memory_space<vmem>>, vector<32x256xbf16>
    %cst = arith.constant dense<0.000000e+00> : vector<32x256xf32>
    %3 = tpu.matmul %1, %2, %cst {dimension_numbers = #tpu.dot_dimension_numbers<[1], [0], [0], [1], [0, 0, 1, 1], [], []>} : vector<32x32xbf16>, vector<32x256xbf16>, vector<32x256xf32> -> vector<32x256xf32>
    %4 = vector.extract_strided_slice %3 {offsets = [0, 0], sizes = [32, 128], strides = [1, 1]} : vector<32x256xf32> to vector<32x128xf32>
    %5 = vector.extract_strided_slice %3 {offsets = [0, 128], sizes = [32, 128], strides = [1, 1]} : vector<32x256xf32> to vector<32x128xf32>
    %6 = arith.mulf %4, %4 : vector<32x128xf32>
    %7 = arith.mulf %5, %5 : vector<32x128xf32>
    %8 = arith.addf %6, %7 : vector<32x128xf32>
    %cst_4 = arith.constant 0.000000e+00 : f32
    %9 = vector.broadcast %cst_4 : f32 to vector<32x128xf32>
    %10 = arith.cmpf ogt, %8, %9 : vector<32x128xf32>
    %cst_5 = arith.constant 1.000000e+00 : f32
    %11 = vector.broadcast %cst_5 : f32 to vector<32x128xf32>
    %12 = arith.select %10, %8, %11 : vector<32x128xi1>, vector<32x128xf32>
    %13 = math.sqrt %12 : vector<32x128xf32>
    %14 = math.rsqrt %13 : vector<32x128xf32>
    %cst_6 = arith.constant 0.000000e+00 : f32
    %15 = vector.broadcast %cst_6 : f32 to vector<32x128xf32>
    %16 = arith.cmpf ogt, %8, %15 : vector<32x128xf32>
    %cst_7 = arith.constant 0.000000e+00 : f32
    %17 = vector.broadcast %cst_7 : f32 to vector<32x128xf32>
    %18 = arith.select %16, %14, %17 : vector<32x128xi1>, vector<32x128xf32>
    %19 = arith.mulf %4, %18 : vector<32x128xf32>
    %c0_8 = arith.constant 0 : index
    %c0_9 = arith.constant 0 : index
    %c0_10 = arith.constant 0 : index
    %20 = vector.load %arg4[%c0_8, %c0_9, %c0_10] : memref<1x32x128xf32, #tpu.memory_space<vmem>>, vector<1x32x128xf32>
    %21 = vector.shape_cast %20 : vector<1x32x128xf32> to vector<32x128xf32>
    %22 = vector.shape_cast %19 : vector<32x128xf32> to vector<1x32x128xf32>
    tpu.vector_store %arg4[%c0_8, %c0_9, %c0_10], %22 {strides = array<i32>} : memref<1x32x128xf32, #tpu.memory_space<vmem>>, vector<1x32x128xf32>,
    %23 = arith.mulf %5, %18 : vector<32x128xf32>
    %c0_11 = arith.constant 0 : index
    %c0_12 = arith.constant 0 : index
    %c0_13 = arith.constant 0 : index
    %24 = vector.load %arg5[%c0_11, %c0_12, %c0_13] : memref<1x32x128xf32, #tpu.memory_space<vmem>>, vector<1x32x128xf32>
    %25 = vector.shape_cast %24 : vector<1x32x128xf32> to vector<32x128xf32>
    %26 = vector.shape_cast %23 : vector<32x128xf32> to vector<1x32x128xf32>
    tpu.vector_store %arg5[%c0_11, %c0_12, %c0_13], %26 {strides = array<i32>} : memref<1x32x128xf32, #tpu.memory_space<vmem>>, vector<1x32x128xf32>,
    return
  }
  func.func @transform_0(%arg0: i32, %arg1: i32) -> (i32, i32, i32) {
    %c0_i32 = arith.constant 0 : i32
    %c0_i32_0 = arith.constant 0 : i32
    return %arg0, %arg1, %c0_i32 : i32, i32, i32
  }
  func.func @transform_1(%arg0: i32, %arg1: i32) -> (i32, i32) {
    %c0_i32 = arith.constant 0 : i32
    %c0_i32_0 = arith.constant 0 : i32
    %c0_i32_1 = arith.constant 0 : i32
    return %c0_i32, %c0_i32_0 : i32, i32
  }
  func.func @transform_2(%arg0: i32, %arg1: i32) -> (i32, i32, i32) {
    %c0_i32 = arith.constant 0 : i32
    %c0_i32_0 = arith.constant 0 : i32
    return %arg0, %arg1, %c0_i32 : i32, i32, i32
  }
  func.func @transform_3(%arg0: i32, %arg1: i32) -> (i32, i32, i32) {
    %c0_i32 = arith.constant 0 : i32
    %c0_i32_0 = arith.constant 0 : i32
    return %arg0, %arg1, %c0_i32 : i32, i32, i32
  }
}

module attributes {stable_mosaic.version = 11 : i64} {
  func.func @_loss_kernel(%arg0: i32, %arg1: memref<1x2x17x17xf32, #tpu.memory_space<vmem>>, %arg2: memref<1x2x17x17xf32, #tpu.memory_space<vmem>>, %arg3: memref<1x2x17x17xf32, #tpu.memory_space<vmem>>, %arg4: memref<1x8x128xf32, #tpu.memory_space<vmem>>, %arg5: memref<1x8x128xf32, #tpu.memory_space<vmem>>) attributes {dimension_semantics = [#tpu.dimension_semantics<parallel>], iteration_bounds = array<i64: 2>, scalar_prefetch = 0 : i64, scratch_operands = 0 : i64, tpu.core_type = #tpu.core_type<tc>, window_params = [{transform_indices = @transform_0, window_bounds = array<i64: 1, 2, 17, 17>}, {transform_indices = @transform_1, window_bounds = array<i64: 1, 2, 17, 17>}, {transform_indices = @transform_2, window_bounds = array<i64: 1, 2, 17, 17>}, {transform_indices = @transform_3, window_bounds = array<i64: 1, 8, 128>}, {transform_indices = @transform_4, window_bounds = array<i64: 1, 8, 128>}]} {
    %c0 = arith.constant 0 : index
    %c0_0 = arith.constant 0 : index
    %c0_1 = arith.constant 0 : index
    %c0_2 = arith.constant 0 : index
    %0 = vector.load %arg1[%c0, %c0_0, %c0_1, %c0_2] : memref<1x2x17x17xf32, #tpu.memory_space<vmem>>, vector<1x1x17x17xf32>
    %1 = vector.shape_cast %0 : vector<1x1x17x17xf32> to vector<17x17xf32>
    %c0_3 = arith.constant 0 : index
    %c1 = arith.constant 1 : index
    %c0_4 = arith.constant 0 : index
    %c0_5 = arith.constant 0 : index
    %2 = vector.load %arg1[%c0_3, %c1, %c0_4, %c0_5] : memref<1x2x17x17xf32, #tpu.memory_space<vmem>>, vector<1x1x17x17xf32>
    %3 = vector.shape_cast %2 : vector<1x1x17x17xf32> to vector<17x17xf32>
    %4 = arith.mulf %1, %1 : vector<17x17xf32>
    %5 = arith.mulf %3, %3 : vector<17x17xf32>
    %6 = arith.addf %4, %5 : vector<17x17xf32>
    %7 = math.sqrt %6 : vector<17x17xf32>
    %cst = arith.constant 0.000000e+00 : f32
    %8 = vector.broadcast %cst : f32 to vector<17x17xf32>
    %cst_6 = arith.constant 0.000000e+00 : f32
    %9 = vector.broadcast %cst_6 : f32 to vector<17x17xf32>
    %c0_7 = arith.constant 0 : index
    %c0_8 = arith.constant 0 : index
    %c0_9 = arith.constant 0 : index
    %c0_10 = arith.constant 0 : index
    %10 = vector.load %arg2[%c0_7, %c0_8, %c0_9, %c0_10] : memref<1x2x17x17xf32, #tpu.memory_space<vmem>>, vector<1x1x17x17xf32>
    %11 = vector.shape_cast %10 : vector<1x1x17x17xf32> to vector<17x17xf32>
    %c0_11 = arith.constant 0 : index
    %c1_12 = arith.constant 1 : index
    %c0_13 = arith.constant 0 : index
    %c0_14 = arith.constant 0 : index
    %12 = vector.load %arg2[%c0_11, %c1_12, %c0_13, %c0_14] : memref<1x2x17x17xf32, #tpu.memory_space<vmem>>, vector<1x1x17x17xf32>
    %13 = vector.shape_cast %12 : vector<1x1x17x17xf32> to vector<17x17xf32>
    %14 = arith.subf %11, %1 : vector<17x17xf32>
    %15 = arith.subf %13, %3 : vector<17x17xf32>
    %16 = arith.mulf %14, %14 : vector<17x17xf32>
    %17 = arith.mulf %15, %15 : vector<17x17xf32>
    %18 = arith.addf %16, %17 : vector<17x17xf32>
    %cst_15 = arith.constant 1.000000e-01 : f32
    %19 = vector.broadcast %cst_15 : f32 to vector<17x17xf32>
    %20 = arith.mulf %19, %18 : vector<17x17xf32>
    %21 = arith.addf %8, %20 : vector<17x17xf32>
    %22 = arith.mulf %11, %11 : vector<17x17xf32>
    %23 = arith.mulf %13, %13 : vector<17x17xf32>
    %24 = arith.addf %22, %23 : vector<17x17xf32>
    %25 = math.sqrt %24 : vector<17x17xf32>
    %26 = arith.subf %25, %7 : vector<17x17xf32>
    %27 = arith.mulf %26, %26 : vector<17x17xf32>
    %cst_16 = arith.constant 1.000000e-01 : f32
    %28 = vector.broadcast %cst_16 : f32 to vector<17x17xf32>
    %29 = arith.mulf %28, %27 : vector<17x17xf32>
    %30 = arith.addf %9, %29 : vector<17x17xf32>
    %c0_17 = arith.constant 0 : index
    %c0_18 = arith.constant 0 : index
    %c0_19 = arith.constant 0 : index
    %c0_20 = arith.constant 0 : index
    %31 = vector.load %arg3[%c0_17, %c0_18, %c0_19, %c0_20] : memref<1x2x17x17xf32, #tpu.memory_space<vmem>>, vector<1x1x17x17xf32>
    %32 = vector.shape_cast %31 : vector<1x1x17x17xf32> to vector<17x17xf32>
    %c0_21 = arith.constant 0 : index
    %c1_22 = arith.constant 1 : index
    %c0_23 = arith.constant 0 : index
    %c0_24 = arith.constant 0 : index
    %33 = vector.load %arg3[%c0_21, %c1_22, %c0_23, %c0_24] : memref<1x2x17x17xf32, #tpu.memory_space<vmem>>, vector<1x1x17x17xf32>
    %34 = vector.shape_cast %33 : vector<1x1x17x17xf32> to vector<17x17xf32>
    %35 = arith.subf %32, %1 : vector<17x17xf32>
    %36 = arith.subf %34, %3 : vector<17x17xf32>
    %37 = arith.mulf %35, %35 : vector<17x17xf32>
    %38 = arith.mulf %36, %36 : vector<17x17xf32>
    %39 = arith.addf %37, %38 : vector<17x17xf32>
    %cst_25 = arith.constant 1.000000e+00 : f32
    %40 = vector.broadcast %cst_25 : f32 to vector<17x17xf32>
    %41 = arith.mulf %40, %39 : vector<17x17xf32>
    %42 = arith.addf %21, %41 : vector<17x17xf32>
    %43 = arith.mulf %32, %32 : vector<17x17xf32>
    %44 = arith.mulf %34, %34 : vector<17x17xf32>
    %45 = arith.addf %43, %44 : vector<17x17xf32>
    %46 = math.sqrt %45 : vector<17x17xf32>
    %47 = arith.subf %46, %7 : vector<17x17xf32>
    %48 = arith.mulf %47, %47 : vector<17x17xf32>
    %cst_26 = arith.constant 1.000000e+00 : f32
    %49 = vector.broadcast %cst_26 : f32 to vector<17x17xf32>
    %50 = arith.mulf %49, %48 : vector<17x17xf32>
    %51 = arith.addf %30, %50 : vector<17x17xf32>
    %52 = vector.shape_cast %42 : vector<17x17xf32> to vector<1x17x17xf32>
    %cst_27 = arith.constant dense<0.000000e+00> : vector<1xf32>
    %53 = vector.multi_reduction <add>, %52, %cst_27 [1, 2] : vector<1x17x17xf32> to vector<1xf32>
    %54 = vector.shape_cast %53 : vector<1xf32> to vector<1x1x1xf32>
    %55 = vector.extract %54[0, 0, 0] : f32 from vector<1x1x1xf32>
    %56 = vector.broadcast %55 : f32 to vector<1x8x128xf32>
    %c0_28 = arith.constant 0 : index
    %c0_29 = arith.constant 0 : index
    %c0_30 = arith.constant 0 : index
    %57 = vector.load %arg4[%c0_28, %c0_29, %c0_30] : memref<1x8x128xf32, #tpu.memory_space<vmem>>, vector<1x8x128xf32>
    tpu.vector_store %arg4[%c0_28, %c0_29, %c0_30], %56 {strides = array<i32>} : memref<1x8x128xf32, #tpu.memory_space<vmem>>, vector<1x8x128xf32>,
    %58 = vector.shape_cast %51 : vector<17x17xf32> to vector<1x17x17xf32>
    %cst_31 = arith.constant dense<0.000000e+00> : vector<1xf32>
    %59 = vector.multi_reduction <add>, %58, %cst_31 [1, 2] : vector<1x17x17xf32> to vector<1xf32>
    %60 = vector.shape_cast %59 : vector<1xf32> to vector<1x1x1xf32>
    %61 = vector.extract %60[0, 0, 0] : f32 from vector<1x1x1xf32>
    %62 = vector.broadcast %61 : f32 to vector<1x8x128xf32>
    %c0_32 = arith.constant 0 : index
    %c0_33 = arith.constant 0 : index
    %c0_34 = arith.constant 0 : index
    %63 = vector.load %arg5[%c0_32, %c0_33, %c0_34] : memref<1x8x128xf32, #tpu.memory_space<vmem>>, vector<1x8x128xf32>
    tpu.vector_store %arg5[%c0_32, %c0_33, %c0_34], %62 {strides = array<i32>} : memref<1x8x128xf32, #tpu.memory_space<vmem>>, vector<1x8x128xf32>,
    return
  }
  func.func @transform_0(%arg0: i32) -> (i32, i32, i32, i32) {
    %c0_i32 = arith.constant 0 : i32
    %c0_i32_0 = arith.constant 0 : i32
    %c0_i32_1 = arith.constant 0 : i32
    %c0_i32_2 = arith.constant 0 : i32
    return %arg0, %c0_i32, %c0_i32_0, %c0_i32_1 : i32, i32, i32, i32
  }
  func.func @transform_1(%arg0: i32) -> (i32, i32, i32, i32) {
    %c0_i32 = arith.constant 0 : i32
    %c0_i32_0 = arith.constant 0 : i32
    %c0_i32_1 = arith.constant 0 : i32
    %c0_i32_2 = arith.constant 0 : i32
    return %arg0, %c0_i32, %c0_i32_0, %c0_i32_1 : i32, i32, i32, i32
  }
  func.func @transform_2(%arg0: i32) -> (i32, i32, i32, i32) {
    %c0_i32 = arith.constant 0 : i32
    %c0_i32_0 = arith.constant 0 : i32
    %c0_i32_1 = arith.constant 0 : i32
    %c0_i32_2 = arith.constant 0 : i32
    return %arg0, %c0_i32, %c0_i32_0, %c0_i32_1 : i32, i32, i32, i32
  }
  func.func @transform_3(%arg0: i32) -> (i32, i32, i32) {
    %c0_i32 = arith.constant 0 : i32
    %c0_i32_0 = arith.constant 0 : i32
    %c0_i32_1 = arith.constant 0 : i32
    return %arg0, %c0_i32, %c0_i32_0 : i32, i32, i32
  }
  func.func @transform_4(%arg0: i32) -> (i32, i32, i32) {
    %c0_i32 = arith.constant 0 : i32
    %c0_i32_0 = arith.constant 0 : i32
    %c0_i32_1 = arith.constant 0 : i32
    return %arg0, %c0_i32, %c0_i32_0 : i32, i32, i32
  }
}

</mosaic_0001>

<bundles_post_ra>
// kernel: gagnet_loss.2
= control target key start
LH: loop header
LB: loop body
LE: loop exit
PB: predicated region body
PF: predicated region fallthrough
CT: control target
= control target key end

     0   :  { %s664_s12 = smov 0   ;;  %s666_s13 = smov 0   ;;  %s770_s0 = inlined_call_operand.vmem [shape: bf16[2,32,32], index: 0, kind: input, shape index: {}]   ;;  %s771_s1 = inlined_call_operand.vmem [shape: bf16[32,256], index: 1, kind: input, shape index: {}]   ;;  %s772_s2 = inlined_call_operand.vmem [shape: f32[2,32,128], index: 2, kind: output, shape index: {0}]   ;;  %s773_s3 = inlined_call_operand.vmem [shape: f32[2,32,128], index: 3, kind: output, shape index: {1}]  }
   0x1   :  { %s668_s14 = smov 0  }
   0x2 LB: > { %s26_s15 = sadd.s32 1, %s637_s13  ;;  %p546_p0 = scmp.ge.s32.totalorder %s641_s14, 1  ;;  %s641_s14 = sphi %s668_s14, %s14_s14   ;;  %s637_s13 = sphi %s666_s13, %s775_s13   ;;  %s633_s12 = sphi %s664_s12, %s774_s12  }
   0x3   : > { %p28_p1 = scmp.ge.s32.totalorder %s26_s15, 2  ;;  %p163_p2 = scmp.lt.s32.totalorder %s641_s14, 3 }
   0x5   : > { %s777_s15 = smov (%p28_p1, %s26_s15), 0  ;;  %p164_p3 = pnand %p546_p0, %p163_p2 }
   0x6   : > { %v595_v0 = vld [vmem:[%s771_s1 + $0x4] ss:$8 sps:$4 sm:$0xff] (!%p164_p3)   ;;  %p205_p4 = scmp.lt.s32.totalorder (!%p164_p3), %s633_s12, 1  ;;  %v597_v1 = vld [vmem:[%s771_s1] ss:$8 sps:$4 sm:$0xff] (!%p164_p3)   ;;  %v643_v2 = vmov (!%p164_p3), 0  }
   0x7   : > { %167 = sbr.rel (%p164_p3) target bundleno = 270 (0x10e), region = 28  ;;  %312 = vmatprep.mubr.bf16.mxu0 (!%p164_p3), %v643_v2  ;;  %322 = vmatprep.mubr.bf16.mxu1 (!%p164_p3), %v643_v2  ;;  %v598_v3 = vld [vmem:[%s771_s1 + $0x14] ss:$8 sps:$4 sm:$0xff] (!%p164_p3)   ;;  %v600_v4 = vld [vmem:[%s771_s1 + $0x10] ss:$8 sps:$4 sm:$0xff] (!%p164_p3)   ;;  %vm273_vm0 = vcmask (!%p164_p3), 261120  }
   0x8   : > { %280 = vmatprep.subr.bf16.mxu0 (!%p164_p3), %v595_v0  ;;  %566 = vmatprep.subr.bf16.mxu1 (!%p164_p3), %v595_v0 }
   0x9   : > { %281 = vmatpush1.bf16.msra.mxu0 (!%p164_p3), %v597_v1  ;;  %568 = vmatpush1.bf16.msra.mxu1 (!%p164_p3), %v597_v1 }
   0xa   : > { %282 = vmatprep.subr.bf16.mxu0 (!%p164_p3), %v598_v3  ;;  %567 = vmatprep.subr.bf16.mxu1 (!%p164_p3), %v598_v3 }
   0xd   : > { %283 = vmatpush1.bf16.msra.mxu0 (!%p164_p3), %v600_v4  ;;  %569 = vmatpush1.bf16.msra.mxu1 (!%p164_p3), %v600_v4 }
   0xe   : > { %s779_s12 = smov (!%p205_p4, %s633_s12), 1 }
   0xf   : > { %s563_s24 = sshll.u32 %s779_s12, 4  ;;  %s564_s28 = sshll.u32 %s779_s12, 5 }
  0x10   : > { %s212_s27 = scalar_lea.vmem %s770_s0, %s563_s24  ;;  %s222_s4 = scalar_lea.vmem %s772_s2, %s564_s28 }
  0x11   : > { %v601_v5 = vld [vmem:[%s212_s27] sm:$0xff]   ;;  %v602_v6 = vld [vmem:[%s212_s27 + $0x8] sm:$0xff]   ;;  %s232_s7 = scalar_lea.vmem %s773_s3, %s564_s28 }
  0x12   : > { %559 = vmatmul.mubr.msk.bf16.vlgmr.msra.gmra.mrb[0].mxu0 %vm273_vm0, %v601_v5  ;;  %560 = vmatmul.mubr.msk.bf16.vlgmr.msra.gmra.mrb[0].mxu1 %vm273_vm0, %v602_v6 }
  0xe5   : > { %v700_v7 = vpop.f32.mrb[0].mxu0  ;;  %v702_v8 = vpop.f32.mrb[0].mxu1 }
  0xe6   : > { %v333_v9 = vmul.f32 %v700_v7, %v700_v7  ;;  %v335_v10 = vmul.f32 %v702_v8, %v702_v8  ;;  %v708_v11 = vpop.f32.mrb[1].mxu0  ;;  %v710_v12 = vpop.f32.mrb[1].mxu1 }
  0xe7   : > { %v337_v13 = vmul.f32 %v708_v11, %v708_v11  ;;  %v339_v14 = vmul.f32 %v710_v12, %v710_v12  ;;  %v716_v15 = vpop.f32.mrb[2].mxu0  ;;  %v718_v16 = vpop.f32.mrb[2].mxu1 }
  0xe8   : > { %v334_v17 = vmul.f32 %v716_v15, %v716_v15  ;;  %v336_v18 = vmul.f32 %v718_v16, %v718_v16  ;;  %v724_v19 = vpop.f32.mrb[3].mxu0  ;;  %v726_v20 = vpop.f32.mrb[3].mxu1 }
  0xe9   : > { %v341_v21 = vadd.f32 %v337_v13, %v333_v9  ;;  %v343_v22 = vadd.f32 %v339_v14, %v335_v10  ;;  %v338_v23 = vmul.f32 %v724_v19, %v724_v19  ;;  %v340_v24 = vmul.f32 %v726_v20, %v726_v20 }
  0xeb   : > { %vm345_vm1 = vcmp.gt.f32.partialorder %v341_v21, 0.0  ;;  %vm347_vm2 = vcmp.gt.f32.partialorder %v343_v22, 0.0  ;;  %v342_v25 = vadd.f32 %v338_v23, %v334_v17  ;;  %v732_v26 = vadd.f32 %v340_v24, %v336_v18 }
  0xec   : > { %v349_v27 = vsel %vm345_vm1, %v341_v21, 1.0  ;;  %v351_v28 = vsel %vm347_vm2, %v343_v22, 1.0 }
  0xed   : > { %603 = vrsqrt.f32 %v349_v27  ;;  %vm346_vm3 = vcmp.gt.f32.partialorder %v342_v25, 0.0  ;;  %vm348_vm4 = vcmp.gt.f32.partialorder %v732_v26, 0.0  ;;  %vm355_vm5 = vcmp.eq.f32.partialorder %v349_v27, inf }
  0xee   : > { %605 = vrsqrt.f32 %v351_v28  ;;  %v350_v29 = vsel %vm346_vm3, %v342_v25, 1.0  ;;  %v352_v30 = vsel %vm348_vm4, %v732_v26, 1.0  ;;  %v358_v34 = vand.u32 2147483648, %v349_v27 }
  0xef   : > { %607 = vrsqrt.f32 %v350_v29  ;;  %vm357_vm6 = vcmp.eq.f32.partialorder %v349_v27, 0.0  ;;  %vm369_vm7 = vcmp.eq.f32.partialorder %v351_v28, inf  ;;  %v372_v37 = vand.u32 2147483648, %v351_v28 }
  0xf0   : > { %609 = vrsqrt.f32 %v352_v30  ;;  %vm371_vm8 = vcmp.eq.f32.partialorder %v351_v28, 0.0  ;;  %vm362_vm9 = vcmp.eq.f32.partialorder %v350_v29, inf  ;;  %v365_v44 = vand.u32 2147483648, %v350_v29 }
  0xf1   : > { %vm364_vm10 = vcmp.eq.f32.partialorder %v350_v29, 0.0  ;;  %vm376_vm11 = vcmp.eq.f32.partialorder %v352_v30, inf  ;;  %v379_v47 = vand.u32 2147483648, %v352_v30  ;;  %vm378_vm12 = vcmp.eq.f32.partialorder %v352_v30, 0.0 }
  0xf7   : > { %v604_v31 = vpop.eup %603 }
  0xf8   : > { %v606_v32 = vpop.eup %605  ;;  %v354_v33 = vmul.f32 %v604_v31, %v349_v27 }
  0xf9   : > { %v368_v35 = vmul.f32 %v606_v32, %v351_v28  ;;  %v608_v38 = vpop.eup %607 }
  0xfa   : > { %v356_v36 = vsel %vm355_vm5, %v349_v27, %v354_v33  ;;  %v610_v41 = vpop.eup %609  ;;  %v361_v43 = vmul.f32 %v608_v38, %v350_v29 }
  0xfb   : > { %v359_v39 = vsel %vm357_vm6, %v358_v34, %v356_v36  ;;  %v370_v40 = vsel %vm369_vm7, %v351_v28, %v368_v35  ;;  %v375_v45 = vmul.f32 %v610_v41, %v352_v30 }
  0xfc   : > { %611 = vrsqrt.f32 %v359_v39  ;;  %v373_v42 = vsel %vm371_vm8, %v372_v37, %v370_v40  ;;  %v363_v46 = vsel %vm362_vm9, %v350_v29, %v361_v43 }
  0xfd   : > { %613 = vrsqrt.f32 %v373_v42  ;;  %v366_v48 = vsel %vm364_vm10, %v365_v44, %v363_v46  ;;  %v377_v49 = vsel %vm376_vm11, %v352_v30, %v375_v45 }
  0xfe   : > { %615 = vrsqrt.f32 %v366_v48  ;;  %v380_v50 = vsel %vm378_vm12, %v379_v47, %v377_v49 }
  0xff   : > { %617 = vrsqrt.f32 %v380_v50 }
 0x106   : > { %v612_v51 = vpop.eup %611 }
 0x107   : > { %v614_v52 = vpop.eup %613  ;;  %v385_v53 = vsel %vm345_vm1, %v612_v51, 0.0 }
 0x108   : > { %v389_v54 = vmul.f32 %v385_v53, %v700_v7  ;;  %v397_v55 = vmul.f32 %v385_v53, %v708_v11  ;;  %v387_v56 = vsel %vm347_vm2, %v614_v52, 0.0  ;;  %v616_v59 = vpop.eup %615 }
 0x109   : > { %v391_v57 = vmul.f32 %v387_v56, %v702_v8  ;;  %v399_v58 = vmul.f32 %v387_v56, %v710_v12  ;;  %v618_v60 = vpop.eup %617  ;;  %v386_v61 = vsel %vm346_vm3, %v616_v59, 0.0 }
 0x10a   : > { %393 = vst [vmem:[%s222_s4] sm:$0xff] %v389_v54  ;;  %401 = vst [vmem:[%s232_s7] sm:$0xff] %v397_v55  ;;  %v390_v62 = vmul.f32 %v386_v61, %v716_v15  ;;  %v398_v63 = vmul.f32 %v386_v61, %v724_v19  ;;  %v388_v0 = vsel %vm348_vm4, %v618_v60, 0.0 }
 0x10b   : > { %395 = vst [vmem:[%s222_s4 + $0x10] sm:$0xff] %v391_v57  ;;  %403 = vst [vmem:[%s232_s7 + $0x10] sm:$0xff] %v399_v58  ;;  %v392_v1 = vmul.f32 %v388_v0, %v718_v16  ;;  %v400_v2 = vmul.f32 %v388_v0, %v726_v20 }
 0x10c   : > { %394 = vst [vmem:[%s222_s4 + $0x8] sm:$0xff] %v390_v62  ;;  %402 = vst [vmem:[%s232_s7 + $0x8] sm:$0xff] %v398_v63 }
 0x10d   : > { %396 = vst [vmem:[%s222_s4 + $0x18] sm:$0xff] %v392_v1  ;;  %404 = vst [vmem:[%s232_s7 + $0x18] sm:$0xff] %v400_v2 }
 0x10e PF: > { %s14_s14 = sadd.s32 1, %s641_s14   ;;  %s774_s12 = smov %s637_s13 }
 0x10f   : > { %p11_p5 = scmp.ge.s32.totalorder %s14_s14, 4   ;;  %s775_s13 = smov %s777_s15 }
 0x111   :  { %13 = sbr.rel (!%p11_p5) target bundleno = 2 (0x2), region = 70 }

// kernel: gagnet_loss.3
= control target key start
LH: loop header
LB: loop body
LE: loop exit
PB: predicated region body
PF: predicated region fallthrough
CT: control target
= control target key end

     0   :  { %s645_s15 = smov 0   ;;  %s797_s0 = inlined_call_operand.vmem [shape: f32[2,2,17,17], index: 0, kind: input, shape index: {}]   ;;  %s798_s1 = inlined_call_operand.vmem [shape: f32[2,2,17,17], index: 1, kind: input, shape index: {}]   ;;  %s799_s2 = inlined_call_operand.vmem [shape: f32[2,2,17,17], index: 2, kind: input, shape index: {}]   ;;  %s800_s3 = inlined_call_operand.vmem [shape: f32[2,8,128], index: 3, kind: output, shape index: {0}]   ;;  %s801_s4 = inlined_call_operand.vmem [shape: f32[2,8,128], index: 4, kind: output, shape index: {1}]  }
   0x1 LB: > { %s560_s16 = sadd.s32 4294967295, %s618_s15   ;;  %p564_p0 = scmp.ge.s32.totalorder %s618_s15, 1  ;;  %s618_s15 = sphi %s645_s15, %s15_s15  }
   0x2   : > { %p185_p1 = scmp.lt.s32.totalorder %s618_s15, 3 }
   0x4   : > { %p186_p2 = pnand %p564_p0, %p185_p1 }
   0x5   : > { %p224_p3 = scmp.lt.s32.totalorder (!%p186_p2), %s560_s16, 1  ;;  %vm803_vm0 = vcmask (!%p186_p2), 138240   ;;  %vm802_vm1 = vcmask (!%p186_p2), 131072  }
   0x6   : > { %189 = sbr.rel (%p186_p2) target bundleno = 271 (0x10f), region = 32 }
   0xd   : > { %s808_s16 = smov (!%p224_p3, %s560_s16), 1 }
   0xe   : > { %s581_s17 = smul.u32 48, %s808_s16  ;;  %s568_s27 = sshll.u32 %s808_s16, 3 }
   0xf   : > { %s242_s30 = scalar_lea.vmem %s800_s3, %s568_s27  ;;  %s246_s8 = scalar_lea.vmem %s801_s4, %s568_s27 }
  0x10   : > { %s228_s20 = scalar_lea.vmem %s797_s0, %s581_s17  ;;  %s233_s23 = scalar_lea.vmem %s798_s1, %s581_s17 }
  0x11   : > { %v248_v0 = vld [vmem:[%s228_s20 + $0x8] sm:$0xff]  ;;  %v249_v1 = vld [vmem:[%s228_s20 + $0x10] sm:$0x1]  ;;  %v247_v2 = vld [vmem:[%s228_s20] sm:$0xff]  ;;  %s665_s26 = scalar_lea.vmem %s799_s2, %s581_s17 }
  0x12   : > { %v571_v3 = vld [vmem:[%s228_s20 + $0x20] sm:$0xff]  ;;  %v572_v4 = vld [vmem:[%s228_s20 + $0x28] sm:$0x1]  ;;  %v255_v5 = vmul.f32 %v248_v0, %v248_v0  ;;  %v286_v8 = vld [vmem:[%s233_s23 + $0x10] sm:$0x1]  ;;  %v256_v10 = vmul.f32 %v249_v1, %v249_v1  ;;  %v254_v31 = vmul.f32 %v247_v2, %v247_v2 }
  0x13   : > { %v284_v6 = vld [vmem:[%s233_s23] sm:$0xff]  ;;  %v285_v7 = vld [vmem:[%s233_s23 + $0x8] sm:$0xff]  ;;  %v570_v9 = vld [vmem:[%s228_s20 + $0x18] sm:$0xff]  ;;  %v293_v15 = vsub.f32 %v286_v8, %v249_v1  ;;  %v258_v16 = vmul.f32 %v571_v3, %v571_v3  ;;  %v259_v17 = vmul.f32 %v572_v4, %v572_v4  ;;  %v314_v48 = vmul.f32 %v286_v8, %v286_v8 }
  0x14   : > { %v573_v11 = vld [vmem:[%s233_s23 + $0x18] sm:$0xff]  ;;  %v574_v12 = vld [vmem:[%s233_s23 + $0x20] sm:$0xff]  ;;  %v291_v13 = vsub.f32 %v284_v6, %v247_v2  ;;  %v292_v14 = vsub.f32 %v285_v7, %v248_v0  ;;  %v575_v18 = vld [vmem:[%s233_s23 + $0x28] sm:$0x1]  ;;  %v257_v27 = vmul.f32 %v570_v9, %v570_v9  ;;  %v312_v33 = vmul.f32 %v284_v6, %v284_v6 }
  0x15   : > { %v294_v19 = vsub.f32 %v573_v11, %v570_v9  ;;  %v295_v20 = vsub.f32 %v574_v12, %v571_v3  ;;  %v296_v21 = vsub.f32 %v575_v18, %v572_v4  ;;  %v299_v24 = vmul.f32 %v293_v15, %v293_v15  ;;  %v354_v29 = vld [vmem:[%s665_s26] sm:$0xff]  ;;  %v355_v30 = vld [vmem:[%s665_s26 + $0x8] sm:$0xff]  ;;  %v356_v40 = vld [vmem:[%s665_s26 + $0x10] sm:$0x1] }
  0x16   : > { %v297_v22 = vmul.f32 %v291_v13, %v291_v13  ;;  %v298_v23 = vmul.f32 %v292_v14, %v292_v14  ;;  %v361_v34 = vsub.f32 %v354_v29, %v247_v2  ;;  %v362_v35 = vsub.f32 %v355_v30, %v248_v0  ;;  %v576_v41 = vld [vmem:[%s665_s26 + $0x18] sm:$0xff]  ;;  %v577_v44 = vld [vmem:[%s665_s26 + $0x20] sm:$0xff]  ;;  %v578_v45 = vld [vmem:[%s665_s26 + $0x28] sm:$0x1] }
  0x17   : > { %v300_v25 = vmul.f32 %v294_v19, %v294_v19  ;;  %v301_v26 = vmul.f32 %v295_v20, %v295_v20  ;;  %v302_v28 = vmul.f32 %v296_v21, %v296_v21  ;;  %v669_v36 = vadd.f32 %v258_v16, %v255_v5 }
  0x18   : > { %v671_v37 = vadd.f32 %v259_v17, %v256_v10  ;;  %v313_v42 = vmul.f32 %v285_v7, %v285_v7  ;;  %v315_v43 = vmul.f32 %v573_v11, %v573_v11  ;;  %v363_v46 = vsub.f32 %v356_v40, %v249_v1 }
  0x19   : > { %v303_v32 = vadd.f32 %v300_v25, %v297_v22  ;;  %v304_v38 = vadd.f32 %v301_v26, %v298_v23  ;;  %v305_v39 = vadd.f32 %v302_v28, %v299_v24  ;;  %v364_v47 = vsub.f32 %v576_v41, %v570_v9 }
  0x1a   : > { %v365_v49 = vsub.f32 %v577_v44, %v571_v3  ;;  %v366_v50 = vsub.f32 %v578_v45, %v572_v4  ;;  %v367_v51 = vmul.f32 %v361_v34, %v361_v34  ;;  %v368_v53 = vmul.f32 %v362_v35, %v362_v35 }
  0x1b   : > { %v306_v52 = vmul.f32 0.1, %v303_v32  ;;  %v369_v54 = vmul.f32 %v363_v46, %v363_v46  ;;  %v370_v55 = vmul.f32 %v364_v47, %v364_v47  ;;  %v307_v56 = vmul.f32 0.1, %v304_v38 }
  0x1c   : > { %v308_v57 = vmul.f32 0.1, %v305_v39  ;;  %v371_v58 = vmul.f32 %v365_v49, %v365_v49  ;;  %v372_v59 = vmul.f32 %v366_v50, %v366_v50  ;;  %v316_v60 = vmul.f32 %v574_v12, %v574_v12 }
  0x1d   : > { %v317_v61 = vmul.f32 %v575_v18, %v575_v18  ;;  %v677_v62 = vadd.f32 %v315_v43, %v312_v33  ;;  %v373_v63 = vadd.f32 %v370_v55, %v367_v51  ;;  %v679_v2 = vadd.f32 %v257_v27, %v254_v31 }
  0x1e   : > { %v374_v0 = vadd.f32 %v371_v58, %v368_v53  ;;  %v375_v1 = vadd.f32 %v372_v59, %v369_v54  ;;  %594 = vrsqrt.f32 %v669_v36  ;;  %v379_v4 = vmul.f32 %v354_v29, %v354_v29 }
  0x1f   : > { %v376_v3 = vadd.f32 %v373_v63, %v306_v52  ;;  %v380_v5 = vmul.f32 %v355_v30, %v355_v30  ;;  %v382_v6 = vmul.f32 %v576_v41, %v576_v41  ;;  %v383_v9 = vmul.f32 %v577_v44, %v577_v44 }
  0x20   : > { %v377_v7 = vadd.f32 %v374_v0, %v307_v56  ;;  %v378_v8 = vadd.f32 %v375_v1, %v308_v57  ;;  %596 = vrsqrt.f32 %v679_v2  ;;  %v683_v10 = vadd.f32 %v316_v60, %v313_v42 }
  0x21   : > { %v381_v11 = vmul.f32 %v356_v40, %v356_v40  ;;  %v384_v12 = vmul.f32 %v578_v45, %v578_v45  ;;  %v419_v13 = vsel %vm803_vm0, %v376_v3, 0.0  ;;  %v686_v14 = vadd.f32 %v317_v61, %v314_v48 }
  0x22   : > { %v420_v15 = vsel %vm803_vm0, %v377_v7, 0.0  ;;  %v423_v16 = vsel %vm802_vm1, %v378_v8, 0.0  ;;  %v690_v17 = vadd.f32 %v382_v6, %v379_v4  ;;  %598 = vrsqrt.f32 %v671_v37 }
  0x23   : > { %v421_v18 = vadd.f32 %v420_v15, %v419_v13  ;;  %v693_v19 = vadd.f32 %v383_v9, %v380_v5  ;;  %600 = vrsqrt.f32 %v677_v62  ;;  %v696_v20 = vadd.f32 %v384_v12, %v381_v11 }
  0x24   : > { %602 = vrsqrt.f32 %v683_v10  ;;  %vm265_vm2 = vcmp.eq.f32.partialorder %v679_v2, inf  ;;  %vm267_vm3 = vcmp.eq.f32.partialorder %v679_v2, 0.0  ;;  %v268_v23 = vand.u32 2147483648, %v679_v2 }
  0x25   : > { %v424_v21 = vadd.f32 %v423_v16, %v421_v18  ;;  %604 = vrsqrt.f32 %v686_v14  ;;  %vm272_vm4 = vcmp.eq.f32.partialorder %v669_v36, inf  ;;  %vm274_vm5 = vcmp.eq.f32.partialorder %v669_v36, 0.0 }
  0x26   : > { %606 = vrsqrt.f32 %v690_v17  ;;  %v275_v24 = vand.u32 2147483648, %v669_v36  ;;  %vm279_vm6 = vcmp.eq.f32.partialorder %v671_v37, inf  ;;  %vm281_vm7 = vcmp.eq.f32.partialorder %v671_v37, 0.0 }
  0x27   : > { %425 = vadd.xlane.f32.xlu0 %v424_v21  ;;  %608 = vrsqrt.f32 %v693_v19  ;;  %v282_v27 = vand.u32 2147483648, %v671_v37  ;;  %vm323_vm8 = vcmp.eq.f32.partialorder %v677_v62, inf  ;;  %vm325_vm9 = vcmp.eq.f32.partialorder %v677_v62, 0.0 }
  0x28   : > { %v595_v22 = vpop.eup %594  ;;  %610 = vrsqrt.f32 %v696_v20  ;;  %v326_v29 = vand.u32 2147483648, %v677_v62  ;;  %vm330_vm10 = vcmp.eq.f32.partialorder %v683_v10, inf  ;;  %vm332_vm11 = vcmp.eq.f32.partialorder %v683_v10, 0.0 }
  0x29   : > { %v271_v26 = vmul.f32 %v595_v22, %v669_v36  ;;  %v333_v30 = vand.u32 2147483648, %v683_v10  ;;  %vm337_vm12 = vcmp.eq.f32.partialorder %v686_v14, inf  ;;  %vm339_vm13 = vcmp.eq.f32.partialorder %v686_v14, 0.0 }
  0x2a   : > { %v597_v25 = vpop.eup %596  ;;  %v340_v33 = vand.u32 2147483648, %v686_v14  ;;  %vm390_vm14 = vcmp.eq.f32.partialorder %v690_v17, inf  ;;  %vm392_vm15 = vcmp.eq.f32.partialorder %v690_v17, 0.0  ;;  %v393_v39 = vand.u32 2147483648, %v690_v17 }
  0x2b   : > { %v264_v28 = vmul.f32 %v597_v25, %v679_v2  ;;  %v273_v35 = vsel %vm272_vm4, %v669_v36, %v271_v26  ;;  %vm397_vm1 = vcmp.eq.f32.partialorder %v693_v19, inf  ;;  %v400_v42 = vand.u32 2147483648, %v693_v19 }
  0x2c   : > { %v599_v31 = vpop.eup %598  ;;  %vm404_vm0 = vcmp.eq.f32.partialorder %v696_v20, inf  ;;  %vm406_vm4 = vcmp.eq.f32.partialorder %v696_v20, 0.0  ;;  %v276_v48 = vsel %vm274_vm5, %v275_v24, %v273_v35  ;;  %v407_v51 = vand.u32 2147483648, %v696_v20 }
  0x2d   : > { %v266_v32 = vsel %vm265_vm2, %v679_v2, %v264_v28  ;;  %v601_v34 = vpop.eup %600  ;;  %v278_v38 = vmul.f32 %v599_v31, %v671_v37  ;;  %vm399_vm2 = vcmp.eq.f32.partialorder %v693_v19, 0.0 }
  0x2e   : > { %v603_v40 = vpop.eup %602  ;;  %v322_v41 = vmul.f32 %v601_v34, %v677_v62  ;;  %v269_v44 = vsel %vm267_vm3, %v268_v23, %v266_v32 }
  0x2f   : > { %v605_v43 = vpop.eup %604  ;;  %v280_v45 = vsel %vm279_vm6, %v671_v37, %v278_v38  ;;  %v329_v46 = vmul.f32 %v603_v40, %v683_v10 }
  0x30   : > { %v607_v47 = vpop.eup %606  ;;  %v324_v49 = vsel %vm323_vm8, %v677_v62, %v322_v41  ;;  %v336_v50 = vmul.f32 %v605_v43, %v686_v14  ;;  %v283_v53 = vsel %vm281_vm7, %v282_v27, %v280_v45 }
  0x31   : > { %v609_v52 = vpop.eup %608  ;;  %v327_v54 = vsel %vm325_vm9, %v326_v29, %v324_v49  ;;  %v331_v36 = vsel %vm330_vm10, %v683_v10, %v329_v46  ;;  %v389_v55 = vmul.f32 %v607_v47, %v690_v17 }
  0x32   : > { %v611_v56 = vpop.eup %610  ;;  %v334_v57 = vsel %vm332_vm11, %v333_v30, %v331_v36  ;;  %v338_v58 = vsel %vm337_vm12, %v686_v14, %v336_v50  ;;  %v342_v59 = vsub.f32 %v327_v54, %v269_v44  ;;  %v396_v37 = vmul.f32 %v609_v52, %v693_v19 }
  0x33   : > { %v341_v60 = vsel %vm339_vm13, %v340_v33, %v338_v58  ;;  %v343_v61 = vsub.f32 %v334_v57, %v276_v48  ;;  %v391_v62 = vsel %vm390_vm14, %v690_v17, %v389_v55  ;;  %v403_v63 = vmul.f32 %v611_v56, %v696_v20 }
  0x34   : > { %v344_v0 = vsub.f32 %v341_v60, %v283_v53  ;;  %v345_v1 = vmul.f32 %v342_v59, %v342_v59  ;;  %v394_v2 = vsel %vm392_vm15, %v393_v39, %v391_v62  ;;  %v398_v3 = vsel %vm397_vm1, %v693_v19, %v396_v37 }
  0x35   : > { %v346_v4 = vmul.f32 %v343_v61, %v343_v61  ;;  %v401_v5 = vsel %vm399_vm2, %v400_v42, %v398_v3  ;;  %v405_v6 = vsel %vm404_vm0, %v696_v20, %v403_v63  ;;  %v409_v7 = vsub.f32 %v394_v2, %v269_v44 }
  0x36   : > { %v347_v8 = vmul.f32 %v344_v0, %v344_v0  ;;  %v348_v9 = vmul.f32 0.1, %v345_v1  ;;  %v408_v10 = vsel %vm406_vm4, %v407_v51, %v405_v6  ;;  %v410_v11 = vsub.f32 %v401_v5, %v276_v48 }
  0x37   : > { %v349_v12 = vmul.f32 0.1, %v346_v4  ;;  %v411_v13 = vsub.f32 %v408_v10, %v283_v53  ;;  %v412_v14 = vmul.f32 %v409_v7, %v409_v7  ;;  %vm804_vm1 = vcmask 138240  }
  0x38   : > { %v350_v15 = vmul.f32 0.1, %v347_v8  ;;  %v413_v16 = vmul.f32 %v410_v11, %v410_v11  ;;  %vm805_vm3 = vmmov %vm804_vm1  ;;  %vm806_vm0 = vcmask 131072  }
  0x39   : > { %v414_v17 = vmul.f32 %v411_v13, %v411_v13  ;;  %v415_v18 = vadd.f32 %v412_v14, %v348_v9 }
  0x3a   : > { %v416_v19 = vadd.f32 %v413_v16, %v349_v12 }
  0x3b   : > { %v417_v21 = vadd.f32 %v414_v17, %v350_v15  ;;  %v436_v22 = vsel %vm804_vm1, %v415_v18, 0.0 }
  0x3c   : > { %v437_v23 = vsel %vm805_vm3, %v416_v19, 0.0 }
  0x3d   : > { %v438_v24 = vadd.f32 %v437_v23, %v436_v22  ;;  %v439_v25 = vsel %vm806_vm0, %v417_v21, 0.0 }
  0x3f   : > { %v440_v26 = vadd.f32 %v439_v25, %v438_v24 }
  0x41   : > { %441 = vadd.xlane.f32.xlu0 %v440_v26 }
  0xb4   : > { %v426_v20 = vpop.xlane.xlu0 %425 }
  0xb5   : > { %v427_v27 = vrot.slane %v426_v20, 4 }
  0xb7   : > { %v428_v28 = vadd.f32 %v427_v27, %v426_v20 }
  0xb9   : > { %v429_v29 = vrot.slane %v428_v28, 2 }
  0xbb   : > { %v430_v30 = vadd.f32 %v429_v29, %v428_v28 }
  0xbd   : > { %v431_v31 = vrot.slane %v430_v30, 1 }
  0xbf   : > { %v432_v32 = vadd.f32 %v431_v31, %v430_v30 }
  0xc1   : > { %582 = vpush %v432_v32 }
  0xce   : > { %v442_v33 = vpop.xlane.xlu0 %441 }
  0xcf   : > { %v443_v34 = vrot.slane %v442_v33, 4 }
  0xd1   : > { %v444_v35 = vadd.f32 %v443_v34, %v442_v33 }
  0xd3   : > { %v445_v38 = vrot.slane %v444_v35, 2 }
  0xd5   : > { %v446_v39 = vadd.f32 %v445_v38, %v444_v35 }
  0xd7   : > { %v447_v40 = vrot.slane %v446_v39, 1 }
  0xd9   : > { %v448_v41 = vadd.f32 %v447_v40, %v446_v39 }
  0xdb   : > { %584 = vpush %v448_v41 }
  0xf2   : > { %s583_s5 = spop %582 }
  0xf3   : > { %v434_v42 = vstv %s583_s5 }
  0xf4   : > { %435 = vst [vmem:[%s242_s30] sm:$0xff] %v434_v42 }
 0x10c   : > { %s585_s9 = spop %584 }
 0x10d   : > { %v450_v43 = vstv %s585_s9 }
 0x10e   : > { %451 = vst [vmem:[%s246_s8] sm:$0xff] %v450_v43 }
 0x10f PF: > { %s15_s15 = sadd.s32 1, %s618_s15  }
 0x110   : > { %p12_p4 = scmp.ge.s32.totalorder %s15_s15, 4  }
 0x112   :  { %14 = sbr.rel (!%p12_p4) target bundleno = 1 (0x1), region = 83 }

</bundles_post_ra>
